<compile_context>
chip_gen: v5e
topology: v5e:2x2
jax: 0.10.0
libtpu: 0.0.40
codegen_flags: <defaults>
</compile_context>

<pallas_src>
import functools

import jax
import jax.numpy as jnp
from jax.experimental import pallas as pl
from jax.experimental.pallas import tpu as pltpu


def _round_up(x, m):
    return ((x + m - 1) // m) * m


def _fused_mlp_kernel(*refs, num_layers, use_bias):
    """refs = (x_ref, w_0..w_L, [b_0..b_L,] o_ref).  L = num_layers (+1 logits layer)."""
    n_w = num_layers + 1
    x_ref = refs[0]
    w_refs = refs[1:1 + n_w]
    if use_bias:
        b_refs = refs[1 + n_w:1 + 2 * n_w]
        o_ref = refs[1 + 2 * n_w]
    else:
        b_refs = (None,) * n_w
        o_ref = refs[1 + n_w]

    h = x_ref[...]
    for i in range(n_w):
        # MXU matmul with f32 accumulation; num_layers is static so this Python loop unrolls.
        y = jnp.dot(h.astype(w_refs[i].dtype), w_refs[i][...],
                    preferred_element_type=jnp.float32)
        if use_bias:
            y = y + b_refs[i][...].astype(jnp.float32)  # (1, n_pad) broadcast, free on VPU
        if i < num_layers:
            y = jnp.maximum(y, 0.0)  # fused ReLU on hidden layers only
        h = y  # stays VMEM/vreg resident in f32
    o_ref[...] = h.astype(o_ref.dtype)


def fused_mlp_forward(x_pad, w_pads, b_pads, *, num_layers, use_bias, tm, out_dtype):
    """Single pallas_call for the whole network.  x_pad: (M_pad, K_pad), weights/biases
    already lane-padded.  Grid tiles the (padded) batch dimension only."""
    m_pad, k_pad = x_pad.shape
    n_out_pad = w_pads[-1].shape[1]
    assert m_pad % tm == 0

    vmem = pltpu.MemorySpace.VMEM
    in_specs = [pl.BlockSpec((tm, k_pad), lambda i: (i, 0), memory_space=vmem)]
    args = [x_pad]
    for w in w_pads:
        in_specs.append(pl.BlockSpec(w.shape, lambda i: (0, 0), memory_space=vmem))
        args.append(w)
    if use_bias:
        for b in b_pads:
            in_specs.append(pl.BlockSpec(b.shape, lambda i: (0, 0), memory_space=vmem))
            args.append(b)

    kernel = functools.partial(_fused_mlp_kernel, num_layers=num_layers, use_bias=use_bias)

    return pl.pallas_call(
        kernel,
        out_shape=jax.ShapeDtypeStruct((m_pad, n_out_pad), out_dtype),
        grid=(m_pad // tm,),
        in_specs=in_specs,
        out_specs=pl.BlockSpec((tm, n_out_pad), lambda i: (i, 0), memory_space=vmem),
        compiler_params=pltpu.CompilerParams(
            dimension_semantics=("parallel",),          # v7x: shard batch tiles across 2 TCs
            vmem_limit_bytes=32 * 1024 * 1024,          # raise v5e's 16 MiB scoped default
        ),
    )(*args)
    # TODO(synk): if layer sizes grow to where padded weights no longer fit VMEM (esp. v7x's
    # 64 MiB), add a K-reduction grid axis with an f32 accumulator scratch instead of
    # full-operand blocks.


class FCCNetworkPallas:
    """JAX/Pallas port of FCCNetwork. Parameters initialized like torch.nn.Linear's default
    (uniform +/- 1/sqrt(fan_in)). Unpadded weights kept for the pure-JAX reference; padded
    copies feed the fused kernel."""

    LANE = 128   # lane width: pad feature dims to multiples of this
    SUBLANE = 8  # f32 sublane count: minimum batch-tile rows

    def __init__(self, input_shape, num_output_classes, num_filters, num_layers,
                 use_bias=False, key=None, dtype=jnp.float32):
        self.input_shape = tuple(input_shape)
        self.num_output_classes = num_output_classes
        self.num_filters = num_filters
        self.num_layers = num_layers
        self.use_bias = use_bias
        self.dtype = dtype

        if key is None:
            key = jax.random.PRNGKey(0)

        flat_dim = 1
        for d in self.input_shape[1:]:
            flat_dim *= d
        self.flat_dim = flat_dim
        self.flat_dim_pad = _round_up(flat_dim, self.LANE)

        self.weights, self.biases = [], []          # unpadded (reference)
        self.weights_pad, self.biases_pad = [], []  # lane-padded (kernel)

        in_dim = flat_dim
        in_dim_pad = self.flat_dim_pad
        out_dims = [num_filters] * num_layers + [num_output_classes]
        for out_dim in out_dims:
            out_dim_pad = _round_up(out_dim, self.LANE)
            key, wk, bk = jax.random.split(key, 3)
            bound = 1.0 / jnp.sqrt(jnp.asarray(in_dim, dtype=jnp.float32))
            w = jax.random.uniform(wk, (in_dim, out_dim), dtype=dtype,
                                   minval=-bound, maxval=bound)
            self.weights.append(w)
            self.weights_pad.append(
                jnp.pad(w, ((0, in_dim_pad - in_dim), (0, out_dim_pad - out_dim))))
            if use_bias:
                b = jax.random.uniform(bk, (out_dim,), dtype=dtype,
                                       minval=-bound, maxval=bound)
                self.biases.append(b)
                self.biases_pad.append(
                    jnp.pad(b, (0, out_dim_pad - out_dim)).reshape(1, out_dim_pad))
            else:
                self.biases.append(None)
                self.biases_pad.append(None)
            in_dim, in_dim_pad = out_dim, out_dim_pad

        self.out_dim_pad = _round_up(num_output_classes, self.LANE)

    def __call__(self, x):
        b = x.shape[0]
        flat = x.reshape(b, -1).astype(self.dtype)

        # Pad batch to sublane granularity (and to 128-multiples if large), features to 128.
        m_pad = _round_up(max(b, self.SUBLANE), self.SUBLANE)
        if m_pad > 128:
            m_pad = _round_up(m_pad, 128)
            tm = 128
        else:
            tm = m_pad
        x_pad = jnp.pad(flat, ((0, m_pad - b), (0, self.flat_dim_pad - self.flat_dim)))

        out_pad = fused_mlp_forward(
            x_pad, self.weights_pad, self.biases_pad,
            num_layers=self.num_layers, use_bias=self.use_bias,
            tm=tm, out_dtype=self.dtype)
        return out_pad[:b, :self.num_output_classes]


def _reference_forward(model, x):
    out = x.reshape(x.shape[0], -1).astype(model.dtype)
    for i in range(model.num_layers):
        out = out @ model.weights[i]
        if model.biases[i] is not None:
            out = out + model.biases[i]
        out = jnp.maximum(out, 0.0)
    out = out @ model.weights[-1]
    if model.biases[-1] is not None:
        out = out + model.biases[-1]
    return out


if __name__ == "__main__":
    # Small shapes consistent with the module: batch=2, channels=4, spatial=16x16 (flat=1024).
    input_shape = (2, 4, 16, 16)
    num_output_classes = 10
    num_filters = 32
    num_layers = 2

    key = jax.random.PRNGKey(0)
    key, xk, k_nobias, k_bias = jax.random.split(key, 4)
    x = jax.random.normal(xk, input_shape, dtype=jnp.float32)

    # use_bias=False (matches the original default)
    model = FCCNetworkPallas(input_shape, num_output_classes, num_filters,
                             num_layers, use_bias=False, key=k_nobias)
    preds = jax.block_until_ready(model(x))
    assert preds.shape == (input_shape[0], num_output_classes)
    ref = jax.block_until_ready(_reference_forward(model, x))
    assert jnp.allclose(preds, ref, atol=1e-4, rtol=1e-4)

    # use_bias=True path (exercises the fused bias add)
    model_b = FCCNetworkPallas(input_shape, num_output_classes, num_filters,
                               num_layers, use_bias=True, key=k_bias)
    preds_b = jax.block_until_ready(model_b(x))
    ref_b = jax.block_until_ready(_reference_forward(model_b, x))
    assert preds_b.shape == (input_shape[0], num_output_classes)
    assert jnp.allclose(preds_b, ref_b, atol=1e-4, rtol=1e-4)

    print("KERNEL_OK")
</pallas_src>

<mosaic_0001>
module attributes {stable_mosaic.version = 11 : i64} {
  func.func @_fused_mlp_kernel(%arg0: i32, %arg1: memref<8x1024xf32, #tpu.memory_space<vmem>>, %arg2: memref<1024x128xf32, #tpu.memory_space<vmem>>, %arg3: memref<128x128xf32, #tpu.memory_space<vmem>>, %arg4: memref<128x128xf32, #tpu.memory_space<vmem>>, %arg5: memref<8x128xf32, #tpu.memory_space<vmem>>) attributes {dimension_semantics = [#tpu.dimension_semantics<parallel>], iteration_bounds = array<i64: 1>, scalar_prefetch = 0 : i64, scratch_operands = 0 : i64, tpu.core_type = #tpu.core_type<tc>, window_params = [{transform_indices = @transform_0, window_bounds = array<i64: 8, 1024>}, {pipeline_mode = #tpu.pipeline_mode<synchronous>, transform_indices = @transform_1, window_bounds = array<i64: 1024, 128>}, {pipeline_mode = #tpu.pipeline_mode<synchronous>, transform_indices = @transform_2, window_bounds = array<i64: 128, 128>}, {pipeline_mode = #tpu.pipeline_mode<synchronous>, transform_indices = @transform_3, window_bounds = array<i64: 128, 128>}, {transform_indices = @transform_4, window_bounds = array<i64: 8, 128>}]} {
    %c0 = arith.constant 0 : index
    %c0_0 = arith.constant 0 : index
    %0 = vector.load %arg1[%c0, %c0_0] : memref<8x1024xf32, #tpu.memory_space<vmem>>, vector<8x1024xf32>
    %c0_1 = arith.constant 0 : index
    %c0_2 = arith.constant 0 : index
    %1 = vector.load %arg2[%c0_1, %c0_2] : memref<1024x128xf32, #tpu.memory_space<vmem>>, vector<1024x128xf32>
    %cst = arith.constant dense<0.000000e+00> : vector<8x128xf32>
    %2 = tpu.matmul %0, %1, %cst {dimension_numbers = #tpu.dot_dimension_numbers<[1], [0], [0], [1], [0, 0, 1, 1], [], []>} : vector<8x1024xf32>, vector<1024x128xf32>, vector<8x128xf32> -> vector<8x128xf32>
    %cst_3 = arith.constant 0.000000e+00 : f32
    %3 = vector.broadcast %cst_3 : f32 to vector<8x128xf32>
    %4 = arith.maximumf %2, %3 : vector<8x128xf32>
    %c0_4 = arith.constant 0 : index
    %c0_5 = arith.constant 0 : index
    %5 = vector.load %arg3[%c0_4, %c0_5] : memref<128x128xf32, #tpu.memory_space<vmem>>, vector<128x128xf32>
    %cst_6 = arith.constant dense<0.000000e+00> : vector<8x128xf32>
    %6 = tpu.matmul %4, %5, %cst_6 {dimension_numbers = #tpu.dot_dimension_numbers<[1], [0], [0], [1], [0, 0, 1, 1], [], []>} : vector<8x128xf32>, vector<128x128xf32>, vector<8x128xf32> -> vector<8x128xf32>
    %cst_7 = arith.constant 0.000000e+00 : f32
    %7 = vector.broadcast %cst_7 : f32 to vector<8x128xf32>
    %8 = arith.maximumf %6, %7 : vector<8x128xf32>
    %c0_8 = arith.constant 0 : index
    %c0_9 = arith.constant 0 : index
    %9 = vector.load %arg4[%c0_8, %c0_9] : memref<128x128xf32, #tpu.memory_space<vmem>>, vector<128x128xf32>
    %cst_10 = arith.constant dense<0.000000e+00> : vector<8x128xf32>
    %10 = tpu.matmul %8, %9, %cst_10 {dimension_numbers = #tpu.dot_dimension_numbers<[1], [0], [0], [1], [0, 0, 1, 1], [], []>} : vector<8x128xf32>, vector<128x128xf32>, vector<8x128xf32> -> vector<8x128xf32>
    %c0_11 = arith.constant 0 : index
    %c0_12 = arith.constant 0 : index
    %11 = vector.load %arg5[%c0_11, %c0_12] : memref<8x128xf32, #tpu.memory_space<vmem>>, vector<8x128xf32>
    tpu.vector_store %arg5[%c0_11, %c0_12], %10 {strides = array<i32>} : memref<8x128xf32, #tpu.memory_space<vmem>>, vector<8x128xf32>,
    return
  }
  func.func @transform_0(%arg0: i32) -> (i32, i32) {
    %c0_i32 = arith.constant 0 : i32
    %c0_i32_0 = arith.constant 0 : i32
    return %arg0, %c0_i32 : i32, i32
  }
  func.func @transform_1(%arg0: i32) -> (i32, i32) {
    %c0_i32 = arith.constant 0 : i32
    %c0_i32_0 = arith.constant 0 : i32
    %c0_i32_1 = arith.constant 0 : i32
    return %c0_i32, %c0_i32_0 : i32, i32
  }
  func.func @transform_2(%arg0: i32) -> (i32, i32) {
    %c0_i32 = arith.constant 0 : i32
    %c0_i32_0 = arith.constant 0 : i32
    %c0_i32_1 = arith.constant 0 : i32
    return %c0_i32, %c0_i32_0 : i32, i32
  }
  func.func @transform_3(%arg0: i32) -> (i32, i32) {
    %c0_i32 = arith.constant 0 : i32
    %c0_i32_0 = arith.constant 0 : i32
    %c0_i32_1 = arith.constant 0 : i32
    return %c0_i32, %c0_i32_0 : i32, i32
  }
  func.func @transform_4(%arg0: i32) -> (i32, i32) {
    %c0_i32 = arith.constant 0 : i32
    %c0_i32_0 = arith.constant 0 : i32
    return %arg0, %c0_i32 : i32, i32
  }
}

</mosaic_0001>

<bundles_post_ra>
// kernel: tpu_custom_call.1
= control target key start
LH: loop header
LB: loop body
LE: loop exit
PB: predicated region body
PF: predicated region fallthrough
CT: control target
= control target key end

     0   :  { %9 = vsyncpa [#allocation3], 0  ;;  %s651_s0 = inlined_call_operand.hbm [shape: f32[8,1024], index: 0, kind: input, shape index: {}]   ;;  %s652_s1 = inlined_call_operand.hbm [shape: f32[1024,128], index: 1, kind: input, shape index: {}]   ;;  %s653_s2 = inlined_call_operand.hbm [shape: f32[128,128], index: 2, kind: input, shape index: {}]   ;;  %s654_s3 = inlined_call_operand.hbm [shape: f32[128,128], index: 3, kind: input, shape index: {}]   ;;  %s655_s4 = inlined_call_operand.hbm [shape: f32[8,128], index: 4, kind: output, shape index: {}]  }
   0x1   :  { %10 = vsyncpa [#allocation6], 0 }
   0x2   :  { %11 = vsyncpa [#allocation9], 0  ;;  %s28_s17 = sshll.u32 %s652_s1, 4  ;;  %s29_s17 = int_to_ptr.hbm [resolvable:$true] %s28_s17 }
   0x3   :  { %12 = vsyncpa [#allocation4], 0  ;;  %s604_s18 = smov [#allocation5]   ;;  %s18_s22 = sshll.u32 %s651_s0, 4  ;;  %s19_s22 = int_to_ptr.hbm [resolvable:$true] %s18_s22 }
   0x4   :  { %s30_s19 = sshll.u32 %s604_s18, 4  ;;  %s605_s23 = smov 128   ;;  %s31_s19 = int_to_ptr.vmem [resolvable:$true] %s30_s19 }
   0x5   :  { %s606_s24 = smov 8   ;;  %s607_s25 = smov [#allocation2]  }
   0x6   :  { %36 = dma.hbm_to_vmem [thread:$0]  %s29_s17, 16384, %s31_s19, [#allocation6], %s605_s23, %s605_s23, %s606_s24  }
   0x7   :  { %s20_s26 = sshll.u32 %s607_s25, 4  ;;  %s41_s29 = sshll.u32 %s653_s2, 4  ;;  %s21_s26 = int_to_ptr.vmem [resolvable:$true] %s20_s26  ;;  %s42_s29 = int_to_ptr.hbm [resolvable:$true] %s41_s29 }
   0x8   :  { %23 = dma.hbm_to_vmem [thread:$0]  %s19_s22, 1024, %s21_s26, [#allocation3]  }
   0x9   :  { %s54_s5 = sshll.u32 %s654_s3, 4  ;;  %s608_s6 = smov [#allocation7]   ;;  %s55_s5 = int_to_ptr.hbm [resolvable:$true] %s54_s5 }
   0xa   :  { %s43_s7 = sshll.u32 %s608_s6, 4  ;;  %s609_s0 = smov [#allocation8]   ;;  %s44_s7 = int_to_ptr.vmem [resolvable:$true] %s43_s7 }
   0xb   :  { %49 = dma.hbm_to_vmem [thread:$0]  %s42_s29, 2048, %s44_s7, [#allocation6], %s605_s23, %s605_s23, %s606_s24  }
   0xc   :  { %s56_s8 = sshll.u32 %s609_s0, 4  ;;  %s57_s8 = int_to_ptr.vmem [resolvable:$true] %s56_s8 }
   0xd   :  { %62 = dma.hbm_to_vmem [thread:$0]  %s55_s5, 2048, %s57_s8, [#allocation9], %s605_s23, %s605_s23, %s606_s24  }
   0xe   :  { %596 = dma.done.wait [#allocation3], 1024  }
   0xf   :  { %597 = vsyncadd [#allocation3], 4294966272 }
  0x10   :  { %598 = dma.done.wait [#allocation6], 18432  }
  0x11   :  { %599 = vsyncadd [#allocation6], 4294948864 }
  0x12   :  { %600 = dma.done.wait [#allocation9], 2048  }
  0x13   :  { %601 = vsyncadd [#allocation9], 4294965248  ;;  %v102_v0 = vld [vmem:[#allocation5 + $0x78] sm:$0xff]  ;;  %v101_v2 = vld [vmem:[#allocation5 + $0x70] sm:$0xff]  ;;  %s610_s2 = smov [#allocation10]   ;;  %s457_s11 = sshll.u32 %s655_s4, 4  ;;  %s458_s11 = int_to_ptr.hbm [resolvable:$true] %s457_s11 }
  0x14   :  { %v134_v1 = vld [vmem:[#allocation5 + $0x178] sm:$0xff]  ;;  %215 = vmatpush.msra.mxu0 %v102_v0  ;;  %v133_v4 = vld [vmem:[#allocation5 + $0x170] sm:$0xff]  ;;  %v100_v6 = vld [vmem:[#allocation5 + $0x68] sm:$0xff]  ;;  %s455_s3 = sshll.u32 %s610_s2, 4  ;;  %s456_s3 = int_to_ptr.vmem [resolvable:$true] %s455_s3 }
  0x15   :  { %255 = vmatpush.msra.mxu2 %v134_v1  ;;  %v118_v3 = vld [vmem:[#allocation5 + $0xf8] sm:$0xff]  ;;  %v117_v7 = vld [vmem:[#allocation5 + $0xf0] sm:$0xff]  ;;  %v132_v8 = vld [vmem:[#allocation5 + $0x168] sm:$0xff] }
  0x16   :  { %v150_v5 = vld [vmem:[#allocation5 + $0x1f8] sm:$0xff]  ;;  %235 = vmatpush.msra.mxu1 %v118_v3  ;;  %216 = vmatpush.msra.mxu0 %v101_v2  ;;  %v149_v9 = vld [vmem:[#allocation5 + $0x1f0] sm:$0xff]  ;;  %v116_v10 = vld [vmem:[#allocation5 + $0xe8] sm:$0xff] }
  0x17   :  { %275 = vmatpush.msra.mxu3 %v150_v5  ;;  %256 = vmatpush.msra.mxu2 %v133_v4  ;;  %v99_v11 = vld [vmem:[#allocation5 + $0x60] sm:$0xff]  ;;  %v148_v13 = vld [vmem:[#allocation5 + $0x1e8] sm:$0xff]  ;;  %v98_v16 = vld [vmem:[#allocation5 + $0x58] sm:$0xff] }
  0x18   :  { %236 = vmatpush.msra.mxu1 %v117_v7  ;;  %v131_v12 = vld [vmem:[#allocation5 + $0x160] sm:$0xff]  ;;  %217 = vmatpush.msra.mxu0 %v100_v6  ;;  %v130_v17 = vld [vmem:[#allocation5 + $0x158] sm:$0xff]  ;;  %v97_v20 = vld [vmem:[#allocation5 + $0x50] sm:$0xff] }
  0x19   :  { %276 = vmatpush.msra.mxu3 %v149_v9  ;;  %257 = vmatpush.msra.mxu2 %v132_v8  ;;  %v115_v14 = vld [vmem:[#allocation5 + $0xe0] sm:$0xff]  ;;  %v114_v18 = vld [vmem:[#allocation5 + $0xd8] sm:$0xff]  ;;  %v129_v21 = vld [vmem:[#allocation5 + $0x150] sm:$0xff] }
  0x1a   :  { %v147_v15 = vld [vmem:[#allocation5 + $0x1e0] sm:$0xff]  ;;  %237 = vmatpush.msra.mxu1 %v116_v10  ;;  %218 = vmatpush.msra.mxu0 %v99_v11  ;;  %v146_v19 = vld [vmem:[#allocation5 + $0x1d8] sm:$0xff]  ;;  %v113_v22 = vld [vmem:[#allocation5 + $0xd0] sm:$0xff] }
  0x1b   :  { %277 = vmatpush.msra.mxu3 %v148_v13  ;;  %258 = vmatpush.msra.mxu2 %v131_v12  ;;  %v145_v23 = vld [vmem:[#allocation5 + $0x1d0] sm:$0xff]  ;;  %v96_v24 = vld [vmem:[#allocation5 + $0x48] sm:$0xff]  ;;  %v95_v28 = vld [vmem:[#allocation5 + $0x40] sm:$0xff] }
  0x1c   :  { %238 = vmatpush.msra.mxu1 %v115_v14  ;;  %219 = vmatpush.msra.mxu0 %v98_v16  ;;  %v128_v25 = vld [vmem:[#allocation5 + $0x148] sm:$0xff]  ;;  %v127_v29 = vld [vmem:[#allocation5 + $0x140] sm:$0xff]  ;;  %v94_v32 = vld [vmem:[#allocation5 + $0x38] sm:$0xff] }
  0x1d   :  { %278 = vmatpush.msra.mxu3 %v147_v15  ;;  %259 = vmatpush.msra.mxu2 %v130_v17  ;;  %v112_v26 = vld [vmem:[#allocation5 + $0xc8] sm:$0xff]  ;;  %v111_v30 = vld [vmem:[#allocation5 + $0xc0] sm:$0xff]  ;;  %v126_v33 = vld [vmem:[#allocation5 + $0x138] sm:$0xff] }
  0x1e   :  { %239 = vmatpush.msra.mxu1 %v114_v18  ;;  %220 = vmatpush.msra.mxu0 %v97_v20  ;;  %v144_v27 = vld [vmem:[#allocation5 + $0x1c8] sm:$0xff]  ;;  %v143_v31 = vld [vmem:[#allocation5 + $0x1c0] sm:$0xff]  ;;  %v110_v34 = vld [vmem:[#allocation5 + $0xb8] sm:$0xff] }
  0x1f   :  { %279 = vmatpush.msra.mxu3 %v146_v19  ;;  %260 = vmatpush.msra.mxu2 %v129_v21  ;;  %v142_v35 = vld [vmem:[#allocation5 + $0x1b8] sm:$0xff]  ;;  %v93_v36 = vld [vmem:[#allocation5 + $0x30] sm:$0xff]  ;;  %v92_v40 = vld [vmem:[#allocation5 + $0x28] sm:$0xff] }
  0x20   :  { %240 = vmatpush.msra.mxu1 %v113_v22  ;;  %221 = vmatpush.msra.mxu0 %v96_v24  ;;  %v125_v37 = vld [vmem:[#allocation5 + $0x130] sm:$0xff]  ;;  %v124_v41 = vld [vmem:[#allocation5 + $0x128] sm:$0xff]  ;;  %v91_v44 = vld [vmem:[#allocation5 + $0x20] sm:$0xff] }
  0x21   :  { %280 = vmatpush.msra.mxu3 %v145_v23  ;;  %261 = vmatpush.msra.mxu2 %v128_v25  ;;  %v109_v38 = vld [vmem:[#allocation5 + $0xb0] sm:$0xff]  ;;  %v108_v42 = vld [vmem:[#allocation5 + $0xa8] sm:$0xff]  ;;  %v123_v45 = vld [vmem:[#allocation5 + $0x120] sm:$0xff] }
  0x22   :  { %241 = vmatpush.msra.mxu1 %v112_v26  ;;  %222 = vmatpush.msra.mxu0 %v95_v28  ;;  %v141_v39 = vld [vmem:[#allocation5 + $0x1b0] sm:$0xff]  ;;  %v140_v43 = vld [vmem:[#allocation5 + $0x1a8] sm:$0xff]  ;;  %v107_v46 = vld [vmem:[#allocation5 + $0xa0] sm:$0xff] }
  0x23   :  { %281 = vmatpush.msra.mxu3 %v144_v27  ;;  %262 = vmatpush.msra.mxu2 %v127_v29  ;;  %v139_v47 = vld [vmem:[#allocation5 + $0x1a0] sm:$0xff]  ;;  %v90_v48 = vld [vmem:[#allocation5 + $0x18] sm:$0xff]  ;;  %v89_v52 = vld [vmem:[#allocation5 + $0x10] sm:$0xff] }
  0x24   :  { %242 = vmatpush.msra.mxu1 %v111_v30  ;;  %223 = vmatpush.msra.mxu0 %v94_v32  ;;  %v122_v49 = vld [vmem:[#allocation5 + $0x118] sm:$0xff]  ;;  %v121_v53 = vld [vmem:[#allocation5 + $0x110] sm:$0xff]  ;;  %v88_v56 = vld [vmem:[#allocation5 + $0x8] sm:$0xff] }
  0x25   :  { %282 = vmatpush.msra.mxu3 %v143_v31  ;;  %263 = vmatpush.msra.mxu2 %v126_v33  ;;  %v106_v50 = vld [vmem:[#allocation5 + $0x98] sm:$0xff]  ;;  %v105_v54 = vld [vmem:[#allocation5 + $0x90] sm:$0xff]  ;;  %v120_v57 = vld [vmem:[#allocation5 + $0x108] sm:$0xff] }
  0x26   :  { %243 = vmatpush.msra.mxu1 %v110_v34  ;;  %224 = vmatpush.msra.mxu0 %v93_v36  ;;  %v138_v51 = vld [vmem:[#allocation5 + $0x198] sm:$0xff]  ;;  %v137_v55 = vld [vmem:[#allocation5 + $0x190] sm:$0xff]  ;;  %v104_v58 = vld [vmem:[#allocation5 + $0x88] sm:$0xff] }
  0x27   :  { %283 = vmatpush.msra.mxu3 %v142_v35  ;;  %264 = vmatpush.msra.mxu2 %v125_v37  ;;  %v136_v59 = vld [vmem:[#allocation5 + $0x188] sm:$0xff]  ;;  %v87_v60 = vld [vmem:[#allocation5] sm:$0xff]  ;;  %v166_v62 = vld [vmem:[#allocation5 + $0x278] sm:$0xff] }
  0x28   :  { %244 = vmatpush.msra.mxu1 %v109_v38  ;;  %225 = vmatpush.msra.mxu0 %v92_v40  ;;  %v119_v61 = vld [vmem:[#allocation5 + $0x100] sm:$0xff]  ;;  %v198_v63 = vld [vmem:[#allocation5 + $0x378] sm:$0xff]  ;;  %v165_v2 = vld [vmem:[#allocation5 + $0x270] sm:$0xff] }
  0x29   :  { %284 = vmatpush.msra.mxu3 %v141_v39  ;;  %265 = vmatpush.msra.mxu2 %v124_v41  ;;  %v103_v0 = vld [vmem:[#allocation5 + $0x80] sm:$0xff]  ;;  %v182_v3 = vld [vmem:[#allocation5 + $0x2f8] sm:$0xff]  ;;  %v197_v4 = vld [vmem:[#allocation5 + $0x370] sm:$0xff] }
  0x2a   :  { %245 = vmatpush.msra.mxu1 %v108_v42  ;;  %226 = vmatpush.msra.mxu0 %v91_v44  ;;  %v135_v1 = vld [vmem:[#allocation5 + $0x180] sm:$0xff]  ;;  %v214_v5 = vld [vmem:[#allocation5 + $0x3f8] sm:$0xff]  ;;  %v164_v6 = vld [vmem:[#allocation5 + $0x268] sm:$0xff] }
  0x2b   :  { %285 = vmatpush.msra.mxu3 %v140_v43  ;;  %266 = vmatpush.msra.mxu2 %v123_v45  ;;  %v181_v7 = vld [vmem:[#allocation5 + $0x2f0] sm:$0xff]  ;;  %v196_v8 = vld [vmem:[#allocation5 + $0x368] sm:$0xff]  ;;  %v163_v10 = vld [vmem:[#allocation5 + $0x260] sm:$0xff] }
  0x2c   :  { %246 = vmatpush.msra.mxu1 %v107_v46  ;;  %227 = vmatpush.msra.mxu0 %v90_v48  ;;  %v213_v9 = vld [vmem:[#allocation5 + $0x3f0] sm:$0xff]  ;;  %v180_v11 = vld [vmem:[#allocation5 + $0x2e8] sm:$0xff]  ;;  %v195_v12 = vld [vmem:[#allocation5 + $0x360] sm:$0xff] }
  0x2d   :  { %286 = vmatpush.msra.mxu3 %v139_v47  ;;  %267 = vmatpush.msra.mxu2 %v122_v49  ;;  %v212_v13 = vld [vmem:[#allocation5 + $0x3e8] sm:$0xff]  ;;  %v162_v14 = vld [vmem:[#allocation5 + $0x258] sm:$0xff]  ;;  %v179_v15 = vld [vmem:[#allocation5 + $0x2e0] sm:$0xff] }
  0x2e   :  { %247 = vmatpush.msra.mxu1 %v106_v50  ;;  %228 = vmatpush.msra.mxu0 %v89_v52  ;;  %v194_v16 = vld [vmem:[#allocation5 + $0x358] sm:$0xff]  ;;  %v211_v17 = vld [vmem:[#allocation5 + $0x3e0] sm:$0xff]  ;;  %v161_v18 = vld [vmem:[#allocation5 + $0x250] sm:$0xff] }
  0x2f   :  { %287 = vmatpush.msra.mxu3 %v138_v51  ;;  %268 = vmatpush.msra.mxu2 %v121_v53  ;;  %v178_v19 = vld [vmem:[#allocation5 + $0x2d8] sm:$0xff]  ;;  %v193_v20 = vld [vmem:[#allocation5 + $0x350] sm:$0xff]  ;;  %v160_v22 = vld [vmem:[#allocation5 + $0x248] sm:$0xff] }
  0x30   :  { %248 = vmatpush.msra.mxu1 %v105_v54  ;;  %229 = vmatpush.msra.mxu0 %v88_v56  ;;  %v210_v21 = vld [vmem:[#allocation5 + $0x3d8] sm:$0xff]  ;;  %v177_v23 = vld [vmem:[#allocation5 + $0x2d0] sm:$0xff]  ;;  %v192_v24 = vld [vmem:[#allocation5 + $0x348] sm:$0xff] }
  0x31   :  { %288 = vmatpush.msra.mxu3 %v137_v55  ;;  %269 = vmatpush.msra.mxu2 %v120_v57  ;;  %v209_v25 = vld [vmem:[#allocation5 + $0x3d0] sm:$0xff]  ;;  %v159_v26 = vld [vmem:[#allocation5 + $0x240] sm:$0xff]  ;;  %v176_v27 = vld [vmem:[#allocation5 + $0x2c8] sm:$0xff] }
  0x32   :  { %249 = vmatpush.msra.mxu1 %v104_v58  ;;  %230 = vmatpush.msra.mxu0 %v87_v60  ;;  %v191_v28 = vld [vmem:[#allocation5 + $0x340] sm:$0xff]  ;;  %v208_v29 = vld [vmem:[#allocation5 + $0x3c8] sm:$0xff]  ;;  %v158_v30 = vld [vmem:[#allocation5 + $0x238] sm:$0xff] }
  0x33   :  { %289 = vmatpush.msra.mxu3 %v136_v59  ;;  %270 = vmatpush.msra.mxu2 %v119_v61  ;;  %v175_v31 = vld [vmem:[#allocation5 + $0x2c0] sm:$0xff]  ;;  %v190_v32 = vld [vmem:[#allocation5 + $0x338] sm:$0xff]  ;;  %v157_v34 = vld [vmem:[#allocation5 + $0x230] sm:$0xff] }
  0x34   :  { %295 = vmatpush.msrb.mxu0 %v166_v62  ;;  %250 = vmatpush.msra.mxu1 %v103_v0  ;;  %v207_v33 = vld [vmem:[#allocation5 + $0x3c0] sm:$0xff]  ;;  %v174_v35 = vld [vmem:[#allocation5 + $0x2b8] sm:$0xff]  ;;  %v189_v36 = vld [vmem:[#allocation5 + $0x330] sm:$0xff] }
  0x35   :  { %335 = vmatpush.msrb.mxu2 %v198_v63  ;;  %290 = vmatpush.msra.mxu3 %v135_v1  ;;  %v206_v37 = vld [vmem:[#allocation5 + $0x3b8] sm:$0xff]  ;;  %v156_v38 = vld [vmem:[#allocation5 + $0x228] sm:$0xff]  ;;  %v173_v39 = vld [vmem:[#allocation5 + $0x2b0] sm:$0xff] }
  0x36   :  { %296 = vmatpush.msrb.mxu0 %v165_v2  ;;  %315 = vmatpush.msrb.mxu1 %v182_v3  ;;  %v188_v40 = vld [vmem:[#allocation5 + $0x328] sm:$0xff]  ;;  %v205_v41 = vld [vmem:[#allocation5 + $0x3b0] sm:$0xff]  ;;  %v155_v43 = vld [vmem:[#allocation5 + $0x220] sm:$0xff] }
  0x37   :  { %336 = vmatpush.msrb.mxu2 %v197_v4  ;;  %355 = vmatpush.msrb.mxu3 %v214_v5  ;;  %v81_v42 = vld [vmem:[#allocation2 + $0x10] sm:$0xff]  ;;  %v172_v44 = vld [vmem:[#allocation5 + $0x2a8] sm:$0xff]  ;;  %v187_v45 = vld [vmem:[#allocation5 + $0x320] sm:$0xff] }
  0x38   :  { %297 = vmatpush.msrb.mxu0 %v164_v6  ;;  %316 = vmatpush.msrb.mxu1 %v181_v7  ;;  %v204_v46 = vld [vmem:[#allocation5 + $0x3a8] sm:$0xff]  ;;  %v79_v47 = vld [vmem:[#allocation2] sm:$0xff]  ;;  %v82_v48 = vld [vmem:[#allocation2 + $0x18] sm:$0xff] }
  0x39   :  { %337 = vmatpush.msrb.mxu2 %v196_v8  ;;  %356 = vmatpush.msrb.mxu3 %v213_v9  ;;  %v154_v49 = vld [vmem:[#allocation5 + $0x218] sm:$0xff]  ;;  %v171_v50 = vld [vmem:[#allocation5 + $0x2a0] sm:$0xff]  ;;  %v80_v53 = vld [vmem:[#allocation2 + $0x8] sm:$0xff] }
  0x3a   :  { %298 = vmatpush.msrb.mxu0 %v163_v10  ;;  %317 = vmatpush.msrb.mxu1 %v180_v11  ;;  %v186_v51 = vld [vmem:[#allocation5 + $0x318] sm:$0xff]  ;;  %v203_v52 = vld [vmem:[#allocation5 + $0x3a0] sm:$0xff]  ;;  %v153_v54 = vld [vmem:[#allocation5 + $0x210] sm:$0xff] }
  0x3b   :  { %338 = vmatpush.msrb.mxu2 %v195_v12  ;;  %357 = vmatpush.msrb.mxu3 %v212_v13  ;;  %v170_v55 = vld [vmem:[#allocation5 + $0x298] sm:$0xff]  ;;  %v185_v56 = vld [vmem:[#allocation5 + $0x310] sm:$0xff]  ;;  %v152_v58 = vld [vmem:[#allocation5 + $0x208] sm:$0xff] }
  0x3c   :  { %299 = vmatpush.msrb.mxu0 %v162_v14  ;;  %318 = vmatpush.msrb.mxu1 %v179_v15  ;;  %v202_v57 = vld [vmem:[#allocation5 + $0x398] sm:$0xff]  ;;  %v169_v59 = vld [vmem:[#allocation5 + $0x290] sm:$0xff]  ;;  %v184_v60 = vld [vmem:[#allocation5 + $0x308] sm:$0xff] }
  0x3d   :  { %339 = vmatpush.msrb.mxu2 %v194_v16  ;;  %358 = vmatpush.msrb.mxu3 %v211_v17  ;;  %v201_v61 = vld [vmem:[#allocation5 + $0x390] sm:$0xff]  ;;  %v151_v62 = vld [vmem:[#allocation5 + $0x200] sm:$0xff]  ;;  %v168_v63 = vld [vmem:[#allocation5 + $0x288] sm:$0xff] }
  0x3e   :  { %300 = vmatpush.msrb.mxu0 %v161_v18  ;;  %319 = vmatpush.msrb.mxu1 %v178_v19  ;;  %v183_v0 = vld [vmem:[#allocation5 + $0x300] sm:$0xff]  ;;  %v200_v1 = vld [vmem:[#allocation5 + $0x388] sm:$0xff]  ;;  %v85_v3 = vld [vmem:[#allocation2 + $0x30] sm:$0xff] }
  0x3f   :  { %340 = vmatpush.msrb.mxu2 %v193_v20  ;;  %359 = vmatpush.msrb.mxu3 %v210_v21  ;;  %v83_v2 = vld [vmem:[#allocation2 + $0x20] sm:$0xff]  ;;  %v84_v6 = vld [vmem:[#allocation2 + $0x28] sm:$0xff]  ;;  %v86_v7 = vld [vmem:[#allocation2 + $0x38] sm:$0xff] }
  0x40   :  { %301 = vmatpush.msrb.mxu0 %v160_v22  ;;  %320 = vmatpush.msrb.mxu1 %v177_v23  ;;  %v167_v4 = vld [vmem:[#allocation5 + $0x280] sm:$0xff]  ;;  %v391_v8 = vld [vmem:[#allocation7 + $0x78] sm:$0xff]  ;;  %v390_v9 = vld [vmem:[#allocation7 + $0x70] sm:$0xff] }
  0x41   :  { %341 = vmatpush.msrb.mxu2 %v192_v24  ;;  %360 = vmatpush.msrb.mxu3 %v209_v25  ;;  %v199_v5 = vld [vmem:[#allocation5 + $0x380] sm:$0xff]  ;;  %v389_v10 = vld [vmem:[#allocation7 + $0x68] sm:$0xff]  ;;  %v387_v12 = vld [vmem:[#allocation7 + $0x58] sm:$0xff] }
  0x42   :  { %302 = vmatpush.msrb.mxu0 %v159_v26  ;;  %321 = vmatpush.msrb.mxu1 %v176_v27  ;;  %v388_v11 = vld [vmem:[#allocation7 + $0x60] sm:$0xff]  ;;  %v386_v13 = vld [vmem:[#allocation7 + $0x50] sm:$0xff]  ;;  %v385_v14 = vld [vmem:[#allocation7 + $0x48] sm:$0xff] }
  0x43   :  { %342 = vmatpush.msrb.mxu2 %v191_v28  ;;  %361 = vmatpush.msrb.mxu3 %v208_v29  ;;  %v384_v15 = vld [vmem:[#allocation7 + $0x40] sm:$0xff]  ;;  %v383_v16 = vld [vmem:[#allocation7 + $0x38] sm:$0xff]  ;;  %v382_v17 = vld [vmem:[#allocation7 + $0x30] sm:$0xff] }
  0x44   :  { %303 = vmatpush.msrb.mxu0 %v158_v30  ;;  %322 = vmatpush.msrb.mxu1 %v175_v31  ;;  %v381_v18 = vld [vmem:[#allocation7 + $0x28] sm:$0xff]  ;;  %v380_v19 = vld [vmem:[#allocation7 + $0x20] sm:$0xff]  ;;  %v379_v20 = vld [vmem:[#allocation7 + $0x18] sm:$0xff] }
  0x45   :  { %343 = vmatpush.msrb.mxu2 %v190_v32  ;;  %362 = vmatpush.msrb.mxu3 %v207_v33  ;;  %v378_v21 = vld [vmem:[#allocation7 + $0x10] sm:$0xff]  ;;  %v377_v22 = vld [vmem:[#allocation7 + $0x8] sm:$0xff]  ;;  %v376_v23 = vld [vmem:[#allocation7] sm:$0xff] }
  0x46   :  { %304 = vmatpush.msrb.mxu0 %v157_v34  ;;  %323 = vmatpush.msrb.mxu1 %v174_v35  ;;  %v428_v24 = vld [vmem:[#allocation8 + $0x78] sm:$0xff]  ;;  %v427_v25 = vld [vmem:[#allocation8 + $0x70] sm:$0xff]  ;;  %v426_v26 = vld [vmem:[#allocation8 + $0x68] sm:$0xff] }
  0x47   :  { %344 = vmatpush.msrb.mxu2 %v189_v36  ;;  %363 = vmatpush.msrb.mxu3 %v206_v37  ;;  %v425_v27 = vld [vmem:[#allocation8 + $0x60] sm:$0xff]  ;;  %v424_v28 = vld [vmem:[#allocation8 + $0x58] sm:$0xff]  ;;  %v423_v29 = vld [vmem:[#allocation8 + $0x50] sm:$0xff] }
  0x48   :  { %305 = vmatpush.msrb.mxu0 %v156_v38  ;;  %324 = vmatpush.msrb.mxu1 %v173_v39  ;;  %v422_v31 = vld [vmem:[#allocation8 + $0x48] sm:$0xff]  ;;  %v421_v33 = vld [vmem:[#allocation8 + $0x40] sm:$0xff]  ;;  %v420_v36 = vld [vmem:[#allocation8 + $0x38] sm:$0xff] }
  0x49   :  { %345 = vmatpush.msrb.mxu2 %v188_v40  ;;  %364 = vmatpush.msrb.mxu3 %v205_v41  ;;  %v419_v39 = vld [vmem:[#allocation8 + $0x30] sm:$0xff]  ;;  %v418_v41 = vld [vmem:[#allocation8 + $0x28] sm:$0xff] }
  0x4a   :  { %271 = vmatmul.f32.vlgmr.msra.gmra.mxu2 %v81_v42  ;;  %306 = vmatpush.msrb.mxu0 %v155_v43 }
  0x4b   :  { %325 = vmatpush.msrb.mxu1 %v172_v44  ;;  %346 = vmatpush.msrb.mxu2 %v187_v45  ;;  %v417_v44 = vld [vmem:[#allocation8 + $0x20] sm:$0xff] }
  0x4c   :  { %365 = vmatpush.msrb.mxu3 %v204_v46  ;;  %231 = vmatmul.f32.vlgmr.msra.gmra.mxu0 %v79_v47  ;;  %v416_v46 = vld [vmem:[#allocation8 + $0x18] sm:$0xff] }
  0x4d   :  { %291 = vmatmul.f32.vlgmr.msra.gmra.mxu3 %v82_v48  ;;  %307 = vmatpush.msrb.mxu0 %v154_v49  ;;  %v415_v48 = vld [vmem:[#allocation8 + $0x10] sm:$0xff] }
  0x4e   :  { %326 = vmatpush.msrb.mxu1 %v171_v50  ;;  %347 = vmatpush.msrb.mxu2 %v186_v51 }
  0x4f   :  { %366 = vmatpush.msrb.mxu3 %v203_v52  ;;  %251 = vmatmul.f32.vlgmr.msra.gmra.mxu1 %v80_v53 }
  0x50   :  { %308 = vmatpush.msrb.mxu0 %v153_v54  ;;  %327 = vmatpush.msrb.mxu1 %v170_v55  ;;  %v414_v54 = vld [vmem:[#allocation8 + $0x8] sm:$0xff]  ;;  %v413_v55 = vld [vmem:[#allocation8] sm:$0xff] }
  0x51   :  { %348 = vmatpush.msrb.mxu2 %v185_v56  ;;  %367 = vmatpush.msrb.mxu3 %v202_v57 }
  0x52   :  { %309 = vmatpush.msrb.mxu0 %v152_v58  ;;  %328 = vmatpush.msrb.mxu1 %v169_v59 }
  0x53   :  { %349 = vmatpush.msrb.mxu2 %v184_v60  ;;  %368 = vmatpush.msrb.mxu3 %v201_v61 }
  0x54   :  { %310 = vmatpush.msrb.mxu0 %v151_v62  ;;  %329 = vmatpush.msrb.mxu1 %v168_v63 }
  0x55   :  { %350 = vmatpush.msrb.mxu2 %v183_v0  ;;  %369 = vmatpush.msrb.mxu3 %v200_v1 }
  0x56   :  { %311 = vmatmul.f32.vlgmr.msrb.gmra.mxu0 %v83_v2  ;;  %351 = vmatmul.f32.vlgmr.msrb.gmra.mxu2 %v85_v3 }
  0x57   :  { %330 = vmatpush.msrb.mxu1 %v167_v4  ;;  %370 = vmatpush.msrb.mxu3 %v199_v5 }
  0x58   :  { %331 = vmatmul.f32.vlgmr.msrb.gmra.mxu1 %v84_v6  ;;  %371 = vmatmul.f32.vlgmr.msrb.gmra.mxu3 %v86_v7 }
  0x59   :  { %392 = vmatpush.msra.mxu0 %v391_v8  ;;  %429 = vmatpush.msra.mxu1 %v428_v24 }
  0x5b   :  { %393 = vmatpush.msra.mxu0 %v390_v9  ;;  %430 = vmatpush.msra.mxu1 %v427_v25 }
  0x5d   :  { %394 = vmatpush.msra.mxu0 %v389_v10  ;;  %431 = vmatpush.msra.mxu1 %v426_v26 }
  0x5f   :  { %395 = vmatpush.msra.mxu0 %v388_v11  ;;  %432 = vmatpush.msra.mxu1 %v425_v27 }
  0x61   :  { %396 = vmatpush.msra.mxu0 %v387_v12  ;;  %433 = vmatpush.msra.mxu1 %v424_v28 }
  0x63   :  { %397 = vmatpush.msra.mxu0 %v386_v13  ;;  %434 = vmatpush.msra.mxu1 %v423_v29 }
  0x65   :  { %398 = vmatpush.msra.mxu0 %v385_v14  ;;  %435 = vmatpush.msra.mxu1 %v422_v31 }
  0x67   :  { %399 = vmatpush.msra.mxu0 %v384_v15  ;;  %436 = vmatpush.msra.mxu1 %v421_v33 }
  0x69   :  { %400 = vmatpush.msra.mxu0 %v383_v16  ;;  %437 = vmatpush.msra.mxu1 %v420_v36 }
  0x6b   :  { %401 = vmatpush.msra.mxu0 %v382_v17  ;;  %438 = vmatpush.msra.mxu1 %v419_v39 }
  0x6d   :  { %402 = vmatpush.msra.mxu0 %v381_v18  ;;  %439 = vmatpush.msra.mxu1 %v418_v41 }
  0x6f   :  { %403 = vmatpush.msra.mxu0 %v380_v19  ;;  %440 = vmatpush.msra.mxu1 %v417_v44 }
  0x71   :  { %404 = vmatpush.msra.mxu0 %v379_v20  ;;  %441 = vmatpush.msra.mxu1 %v416_v46 }
  0x73   :  { %405 = vmatpush.msra.mxu0 %v378_v21  ;;  %442 = vmatpush.msra.mxu1 %v415_v48 }
  0x75   :  { %406 = vmatpush.msra.mxu0 %v377_v22  ;;  %443 = vmatpush.msra.mxu1 %v414_v54 }
  0x77   :  { %407 = vmatpush.msra.mxu0 %v376_v23  ;;  %444 = vmatpush.msra.mxu1 %v413_v55 }
  0xc9   :  { %v232_v30 = vpop.f32.mrf.mxu0 }
  0xcc   :  { %v252_v32 = vpop.f32.mrf.mxu1 }
  0xcd   :  { %v253_v34 = vadd.f32 %v252_v32, %v232_v30  ;;  %v272_v35 = vpop.f32.mrf.mxu2 }
  0xcf   :  { %v273_v37 = vadd.f32 %v272_v35, %v253_v34 }
  0xd0   :  { %v292_v38 = vpop.f32.mrf.mxu3 }
  0xd1   :  { %v293_v40 = vadd.f32 %v292_v38, %v273_v37 }
  0xd3   :  { %v312_v42 = vpop.f32.mrf.mxu0 }
  0xd4   :  { %v313_v43 = vadd.f32 %v312_v42, %v293_v40 }
  0xd5   :  { %v332_v45 = vpop.f32.mrf.mxu1 }
  0xd6   :  { %v333_v47 = vadd.f32 %v332_v45, %v313_v43 }
  0xd9   :  { %v352_v49 = vpop.f32.mrf.mxu2 }
  0xda   :  { %v353_v50 = vadd.f32 %v352_v49, %v333_v47 }
  0xdb   :  { %v372_v51 = vpop.f32.mrf.mxu3 }
  0xdc   :  { %v373_v52 = vadd.f32 %v372_v51, %v353_v50 }
  0xde   :  { %v375_v53 = vmax.f32 %v373_v52, 0.0 }
  0xe0   :  { %408 = vmatmul.f32.vlgmr.msra.gmra.mxu0 %v375_v53 }
 0x15d   :  { %v409_v56 = vpop.f32.mrf.mxu0 }
 0x15e   :  { %v412_v57 = vmax.f32 %v409_v56, 0.0 }
 0x160   :  { %445 = vmatmul.f32.vlgmr.msra.gmra.mxu1 %v412_v57 }
 0x1dd   :  { %v446_v58 = vpop.f32.mrf.mxu1 }
 0x1de   :  { %449 = vst [vmem:[#allocation10] sm:$0xff] %v446_v58 }
 0x1df   :  { %460 = dma.vmem_to_hbm [thread:$0]  %s456_s3, 128, %s458_s11, [#allocation4]  }
 0x1e0   :  { %602 = dma.done.wait [#allocation4], 128  }
 0x1e1   :  { %603 = vsyncadd [#allocation4], 4294967168 }
 0x1e2   :  { %465 = vsyncpa [#allocation3], 1 }
 0x1e3   :  { %466 = vsyncpa [#allocation6], 1 }
 0x1e4   :  { %467 = vsyncpa [#allocation9], 1 }
 0x1e5   :  { %468 = vsyncpa [#allocation4], 1 }

</bundles_post_ra>
